<compile_context>
chip_gen: v5e
topology: v5e:2x2
jax: 0.10.0
libtpu: 0.0.40
codegen_flags: <defaults>
</compile_context>

<pallas_src>
import functools

import jax
import jax.numpy as jnp
from jax.experimental import pallas as pl
from jax.experimental.pallas import tpu as pltpu


def _cdiv(a, b):
    return -(-a // b)


def _vmem_capacity_bytes():
    cap = None
    try:
        cap = int(pltpu.get_tpu_info().vmem_capacity_bytes)
    except Exception:
        cap = None
    if not cap or cap <= 0:
        cap = 64 * 1024 * 1024          # v7x-safe fallback (per-TensorCore)
    try:
        kind = jax.devices()[0].device_kind.lower()
        if "v7" in kind:
            # v7x has 64 MiB per TensorCore; clamp in case the query reports a
            # per-chip (2-TC) figure so the scoped request never overshoots.
            cap = min(cap, 64 * 1024 * 1024)
    except Exception:
        pass
    return cap


def _num_tensorcores():
    """Best-effort TensorCores-per-chip (controls the 'parallel' group split)."""
    try:
        info = pltpu.get_tpu_info()
        for attr in ("num_tensorcores", "num_cores", "tensorcore_count"):
            v = getattr(info, attr, None)
            if v:
                return max(1, int(v))
    except Exception:
        pass
    try:
        kind = jax.devices()[0].device_kind.lower()
    except Exception:
        return 1
    if "lite" in kind or "v5e" in kind or "v6" in kind:
        return 1                        # v5e / v6e: single TensorCore
    if "v7" in kind or "v4" in kind or "v5p" in kind:
        return 2                        # dual-TC / megacore chips
    return 1


def _pick_row_block(r):
    """Rows per block. All rows in one block unless N*C is very large; row
    blocks keep per-row contiguous DMA runs long instead of shrinking ts."""
    if r <= 1024:
        return r
    for rb in (1024, 512, 256, 128, 64, 32, 16, 8):
        if r % rb == 0:
            return rb
    # TODO(synk): mask a ragged row tail for very large N*C with awkward factors.
    return r


def _pick_spatial_tile(rb, s_total, itemsize, vmem_bytes):
    """Largest 128-multiple spatial tile that (a) keeps the double-buffered
    input pipeline + resident f32 accumulator outputs under ~40% of VMEM and
    (b) targets a few MiB of input DMA per grid step (amortizes the ~0.35us
    per-step overhead even at ~3.2 TB/s HBM) rather than a fixed lane cap."""
    out_resident = 2 * 2 * rb * 128 * 4          # 2 outputs x ~2 buffers, f32
    budget = int(vmem_bytes * 0.4) - out_resident
    per_lane = 2 * 2 * rb * itemsize             # 2 inputs x 2 pipeline buffers
    ts = budget // max(per_lane, 1)
    ts = (ts // 128) * 128
    step_target_bytes = 8 * 1024 * 1024          # combined input bytes per step
    cap = (step_target_bytes // max(2 * rb * itemsize, 1) // 128) * 128
    ts = min(ts, max(cap, 128))
    ts = max(ts, 128)
    if s_total >= 128:
        ts = min(ts, (s_total // 128) * 128)
    else:
        ts = s_total                              # tiny spatial: one full block
    return ts
    # TODO(synk): pipeline_mode=pl.Buffered(3) on the inputs is a fallback for
    # tiny problems where ts == s_total and per-step DMA latency is exposed.


def _dice_partial_kernel(x_ref, t_ref, inter_ref, sums_ref, *,
                         ts, acc_w, s_total, chunks_per_group, need_mask):
    """Accumulate per-row partial sums of (x*t) and (x+t) over spatial tiles.

    Grid = (row_block, group, step): axes 0/1 are "parallel" (independent
    outputs; group splits spatial chunks across TensorCores on dual-TC chips),
    axis 2 ("arbitrary") walks a group's chunks and revisits the same
    lane-dense (rb, acc_w) f32 output block, which doubles as the accumulator.
    The hot loop carries vreg-local accumulators; the refs see exactly one
    read-modify-write per tile.
    """
    g = pl.program_id(1)
    j = pl.program_id(2)

    @pl.when(j == 0)
    def _():
        inter_ref[...] = jnp.zeros_like(inter_ref)
        sums_ref[...] = jnp.zeros_like(sums_ref)

    rows = x_ref.shape[0]
    n_inner = ts // acc_w
    zeros = jnp.zeros((rows, acc_w), jnp.float32)

    def make_body(mask_base, lane):
        def body(i, carry):
            inter_acc, sums_acc = carry
            off = i * acc_w
            if not isinstance(off, int):            # traced (fori_loop) index
                off = pl.multiple_of(off, acc_w)
            xg = x_ref[:, pl.ds(off, acc_w)].astype(jnp.float32)
            tg = t_ref[:, pl.ds(off, acc_w)].astype(jnp.float32)
            if mask_base is not None:
                valid = (mask_base + off + lane) < s_total
                xg = jnp.where(valid, xg, 0.0)
                tg = jnp.where(valid, tg, 0.0)
            return inter_acc + xg * tg, sums_acc + (xg + tg)
        return body

    def run_loop(body):
        if n_inner <= 8:
            # Short tiles: full static unroll (best LLO visibility).
            carry = (zeros, zeros)
            for idx in range(n_inner):
                carry = body(idx, carry)
            return carry
        return jax.lax.fori_loop(0, n_inner, body, (zeros, zeros), unroll=8)

    if need_mask:
        chunk = g * chunks_per_group + j            # un-clamped global chunk id
        base = chunk * ts                           # global lane offset of tile
        is_full = (chunk + 1) * ts <= s_total       # fully interior tile?

        @pl.when(is_full)
        def _():
            inter_acc, sums_acc = run_loop(make_body(None, None))
            inter_ref[...] += inter_acc
            sums_ref[...] += sums_acc

        @pl.when(jnp.logical_not(is_full))
        def _():
            # Ragged tail or fully-padded duplicate chunk: mask invalid lanes
            # (duplicate chunks have base >= s_total, so they contribute zero).
            lane = jax.lax.broadcasted_iota(jnp.int32, (rows, acc_w), 1)
            inter_acc, sums_acc = run_loop(make_body(base, lane))
            inter_ref[...] += inter_acc
            sums_ref[...] += sums_acc
    else:
        inter_acc, sums_acc = run_loop(make_body(None, None))
        inter_ref[...] += inter_acc
        sums_ref[...] += sums_acc


def multiclass_dice_loss(inputs, targets, reduce_batch_first=False,
                         epsilon=1e-6):
    """Pallas implementation of MulticlassDice.forward. Inputs: [N, C, *spatial]."""
    assert inputs.shape == targets.shape
    n, c = inputs.shape[:2]
    s_total = 1
    for d in inputs.shape[2:]:
        s_total *= d
    r = n * c

    # Keep native dtypes in HBM (no up-cast, no pad round-trip).
    x2 = inputs.reshape(r, s_total)
    t2 = targets.reshape(r, s_total)

    itemsize = max(x2.dtype.itemsize, t2.dtype.itemsize)
    vmem_bytes = _vmem_capacity_bytes()

    rb = _pick_row_block(r)
    row_blocks = r // rb

    ts = _pick_spatial_tile(rb, s_total, itemsize, vmem_bytes)
    acc_w = 128 if ts >= 128 else ts

    num_chunks = _cdiv(s_total, ts)
    # Dual-TC chips: split chunks into 2 independent groups; 1-TC chips keep a
    # single group (no duplicate-chunk DMA, no extra output block).
    n_groups = max(1, min(_num_tensorcores(), num_chunks))
    cpg = _cdiv(num_chunks, n_groups)
    need_mask = (s_total % ts != 0) or (n_groups * cpg != num_chunks)

    kernel = functools.partial(
        _dice_partial_kernel, ts=ts, acc_w=acc_w, s_total=s_total,
        chunks_per_group=cpg, need_mask=need_mask)

    def in_map(i, g, j):
        chunk = g * cpg + j
        # Clamp padded (duplicate) chunks so the DMA stays in-bounds; their
        # contribution is fully masked to zero in-kernel.
        return (i, jnp.minimum(chunk, num_chunks - 1))

    in_spec = pl.BlockSpec((rb, ts), in_map)
    out_spec = pl.BlockSpec((rb, acc_w), lambda i, g, j: (i, g))

    inter_out, sums_out = pl.pallas_call(
        kernel,
        out_shape=(
            jax.ShapeDtypeStruct((r, acc_w * n_groups), jnp.float32),
            jax.ShapeDtypeStruct((r, acc_w * n_groups), jnp.float32),
        ),
        grid_spec=pltpu.PrefetchScalarGridSpec(
            num_scalar_prefetch=0,
            grid=(row_blocks, n_groups, cpg),
            in_specs=[in_spec, in_spec],
            out_specs=[out_spec, out_spec],
        ),
        compiler_params=pltpu.CompilerParams(
            # TODO(synk): on v7x verify in xprof that the group axis lands on
            # both TensorCores; switch it to pltpu.CORE_PARALLEL if it doesn't.
            dimension_semantics=("parallel", "parallel", "arbitrary"),
            vmem_limit_bytes=int(vmem_bytes * 0.85),
        ),
    )(x2, t2)

    # Tiny epilogue (lane reduce + dice ratio + mean) in plain JAX.
    inter = jnp.sum(inter_out, axis=-1).reshape(n, c)
    sums = jnp.sum(sums_out, axis=-1).reshape(n, c)
    if reduce_batch_first:
        inter = jnp.sum(inter, axis=0)
        sums = jnp.sum(sums, axis=0)
    sets_sum = jnp.where(sums == 0.0, 2.0 * inter, sums)
    dice = (2.0 * inter + epsilon) / (sets_sum + epsilon)
    return 1.0 - jnp.mean(dice)


def multiclass_dice_ref(inputs, targets, reduce_batch_first=False,
                        epsilon=1e-6):
    """Pure-JAX mirror of the PyTorch module (loop structure preserved)."""
    def dice_coeff_single(i_flat, t_flat):
        inter = jnp.sum(i_flat * t_flat)
        sets = jnp.sum(i_flat) + jnp.sum(t_flat)
        sets = jnp.where(sets == 0.0, 2.0 * inter, sets)
        return (2.0 * inter + epsilon) / (sets + epsilon)

    n, c = inputs.shape[:2]
    dice = 0.0
    for ch in range(c):
        ich, tch = inputs[:, ch], targets[:, ch]
        if reduce_batch_first:
            dice += dice_coeff_single(ich.reshape(-1), tch.reshape(-1))
        else:
            d = 0.0
            for b in range(n):
                d += dice_coeff_single(ich[b].reshape(-1), tch[b].reshape(-1))
            dice += d / n
    return 1.0 - dice / c


if __name__ == "__main__":
    key = jax.random.PRNGKey(0)
    k1, k2 = jax.random.split(key)

    # Small multi-class segmentation shapes: N=2, C=4, 16x16 spatial.
    shape = (2, 4, 16, 16)
    logits = jax.random.normal(k1, shape, dtype=jnp.float32)
    inp = jax.nn.softmax(logits, axis=1)                         # predictions
    classes = jax.random.randint(k2, (2, 16, 16), 0, 4)
    tgt = jax.nn.one_hot(classes, 4, axis=1, dtype=jnp.float32)  # one-hot target

    loss = jax.block_until_ready(multiclass_dice_loss(inp, tgt))
    ref = jax.block_until_ready(multiclass_dice_ref(inp, tgt))
    assert jnp.allclose(loss, ref, rtol=1e-5, atol=1e-6), (loss, ref)

    loss_rb = jax.block_until_ready(
        multiclass_dice_loss(inp, tgt, reduce_batch_first=True))
    ref_rb = jax.block_until_ready(
        multiclass_dice_ref(inp, tgt, reduce_batch_first=True))
    assert jnp.allclose(loss_rb, ref_rb, rtol=1e-5, atol=1e-6), (loss_rb, ref_rb)

    print("KERNEL_OK")
</pallas_src>

<mosaic_0001>
module attributes {stable_mosaic.version = 11 : i64} {
  func.func @_dice_partial_kernel(%arg0: i32, %arg1: i32, %arg2: i32, %arg3: memref<8x256xf32, #tpu.memory_space<vmem>>, %arg4: memref<8x256xf32, #tpu.memory_space<vmem>>, %arg5: memref<8x128xf32, #tpu.memory_space<vmem>>, %arg6: memref<8x128xf32, #tpu.memory_space<vmem>>) attributes {dimension_semantics = [#tpu.dimension_semantics<parallel>, #tpu.dimension_semantics<parallel>, #tpu.dimension_semantics<arbitrary>], iteration_bounds = array<i64: 1, 1, 1>, scalar_prefetch = 0 : i64, scratch_operands = 0 : i64, tpu.core_type = #tpu.core_type<tc>, window_params = [{transform_indices = @transform_0, window_bounds = array<i64: 8, 256>}, {transform_indices = @transform_1, window_bounds = array<i64: 8, 256>}, {transform_indices = @transform_2, window_bounds = array<i64: 8, 128>}, {transform_indices = @transform_3, window_bounds = array<i64: 8, 128>}]} {
    %c0_i32 = arith.constant 0 : i32
    %0 = arith.cmpi eq, %arg2, %c0_i32 : i32
    %1 = arith.extui %0 : i1 to i32
    %c0_i32_0 = arith.constant 0 : i32
    %2 = arith.cmpi ne, %1, %c0_i32_0 : i32
    scf.if %2 {
      %cst_15 = arith.constant 0.000000e+00 : f32
      %22 = vector.broadcast %cst_15 : f32 to vector<8x128xf32>
      %c0_16 = arith.constant 0 : index
      %c0_17 = arith.constant 0 : index
      %23 = vector.load %arg5[%c0_16, %c0_17] : memref<8x128xf32, #tpu.memory_space<vmem>>, vector<8x128xf32>
      tpu.vector_store %arg5[%c0_16, %c0_17], %22 {strides = array<i32>} : memref<8x128xf32, #tpu.memory_space<vmem>>, vector<8x128xf32>,
      %cst_18 = arith.constant 0.000000e+00 : f32
      %24 = vector.broadcast %cst_18 : f32 to vector<8x128xf32>
      %c0_19 = arith.constant 0 : index
      %c0_20 = arith.constant 0 : index
      %25 = vector.load %arg6[%c0_19, %c0_20] : memref<8x128xf32, #tpu.memory_space<vmem>>, vector<8x128xf32>
      tpu.vector_store %arg6[%c0_19, %c0_20], %24 {strides = array<i32>} : memref<8x128xf32, #tpu.memory_space<vmem>>, vector<8x128xf32>,
    } else {
    }
    %cst = arith.constant 0.000000e+00 : f32
    %3 = vector.broadcast %cst : f32 to vector<8x128xf32>
    %c0 = arith.constant 0 : index
    %c0_1 = arith.constant 0 : index
    %4 = vector.load %arg3[%c0, %c0_1] : memref<8x256xf32, #tpu.memory_space<vmem>>, vector<8x128xf32>
    %c0_2 = arith.constant 0 : index
    %c0_3 = arith.constant 0 : index
    %5 = vector.load %arg4[%c0_2, %c0_3] : memref<8x256xf32, #tpu.memory_space<vmem>>, vector<8x128xf32>
    %6 = arith.mulf %4, %5 : vector<8x128xf32>
    %7 = arith.addf %3, %6 : vector<8x128xf32>
    %8 = arith.addf %4, %5 : vector<8x128xf32>
    %9 = arith.addf %3, %8 : vector<8x128xf32>
    %c0_4 = arith.constant 0 : index
    %c128 = arith.constant 128 : index
    %10 = vector.load %arg3[%c0_4, %c128] : memref<8x256xf32, #tpu.memory_space<vmem>>, vector<8x128xf32>
    %c0_5 = arith.constant 0 : index
    %c128_6 = arith.constant 128 : index
    %11 = vector.load %arg4[%c0_5, %c128_6] : memref<8x256xf32, #tpu.memory_space<vmem>>, vector<8x128xf32>
    %12 = arith.mulf %10, %11 : vector<8x128xf32>
    %13 = arith.addf %7, %12 : vector<8x128xf32>
    %14 = arith.addf %10, %11 : vector<8x128xf32>
    %15 = arith.addf %9, %14 : vector<8x128xf32>
    %c0_7 = arith.constant 0 : index
    %c0_8 = arith.constant 0 : index
    %16 = vector.load %arg5[%c0_7, %c0_8] : memref<8x128xf32, #tpu.memory_space<vmem>>, vector<8x128xf32>
    %17 = arith.addf %16, %13 : vector<8x128xf32>
    %c0_9 = arith.constant 0 : index
    %c0_10 = arith.constant 0 : index
    %18 = vector.load %arg5[%c0_9, %c0_10] : memref<8x128xf32, #tpu.memory_space<vmem>>, vector<8x128xf32>
    tpu.vector_store %arg5[%c0_9, %c0_10], %17 {strides = array<i32>} : memref<8x128xf32, #tpu.memory_space<vmem>>, vector<8x128xf32>,
    %c0_11 = arith.constant 0 : index
    %c0_12 = arith.constant 0 : index
    %19 = vector.load %arg6[%c0_11, %c0_12] : memref<8x128xf32, #tpu.memory_space<vmem>>, vector<8x128xf32>
    %20 = arith.addf %19, %15 : vector<8x128xf32>
    %c0_13 = arith.constant 0 : index
    %c0_14 = arith.constant 0 : index
    %21 = vector.load %arg6[%c0_13, %c0_14] : memref<8x128xf32, #tpu.memory_space<vmem>>, vector<8x128xf32>
    tpu.vector_store %arg6[%c0_13, %c0_14], %20 {strides = array<i32>} : memref<8x128xf32, #tpu.memory_space<vmem>>, vector<8x128xf32>,
    return
  }
  func.func @transform_0(%arg0: i32, %arg1: i32, %arg2: i32) -> (i32, i32) {
    %c1_i32 = arith.constant 1 : i32
    %0 = arith.muli %arg1, %c1_i32 : i32
    %1 = arith.addi %0, %arg2 : i32
    %c0_i32 = arith.constant 0 : i32
    %2 = arith.minsi %1, %c0_i32 : i32
    %c0_i32_0 = arith.constant 0 : i32
    return %arg0, %2 : i32, i32
  }
  func.func @transform_1(%arg0: i32, %arg1: i32, %arg2: i32) -> (i32, i32) {
    %c1_i32 = arith.constant 1 : i32
    %0 = arith.muli %arg1, %c1_i32 : i32
    %1 = arith.addi %0, %arg2 : i32
    %c0_i32 = arith.constant 0 : i32
    %2 = arith.minsi %1, %c0_i32 : i32
    %c0_i32_0 = arith.constant 0 : i32
    return %arg0, %2 : i32, i32
  }
  func.func @transform_2(%arg0: i32, %arg1: i32, %arg2: i32) -> (i32, i32) {
    %c0_i32 = arith.constant 0 : i32
    return %arg0, %arg1 : i32, i32
  }
  func.func @transform_3(%arg0: i32, %arg1: i32, %arg2: i32) -> (i32, i32) {
    %c0_i32 = arith.constant 0 : i32
    return %arg0, %arg1 : i32, i32
  }
}

</mosaic_0001>

<bundles_post_ra>
// kernel: tpu_custom_call.1
= control target key start
LH: loop header
LB: loop body
LE: loop exit
PB: predicated region body
PF: predicated region fallthrough
CT: control target
= control target key end

     0   :  { %9 = vsyncpa [#allocation3], 0  ;;  %s270_s0 = inlined_call_operand.hbm [shape: f32[8,256], index: 0, kind: input, shape index: {}]   ;;  %s271_s1 = inlined_call_operand.hbm [shape: f32[8,256], index: 1, kind: input, shape index: {}]   ;;  %s272_s2 = inlined_call_operand.hbm [shape: f32[8,128], index: 2, kind: output, shape index: {0}]   ;;  %s273_s3 = inlined_call_operand.hbm [shape: f32[8,128], index: 3, kind: output, shape index: {1}]  }
   0x1   :  { %10 = vsyncpa [#allocation6], 0 }
   0x2   :  { %11 = vsyncpa [#allocation4], 0 }
   0x3   :  { %12 = vsyncpa [#allocation9], 0  ;;  %s24_s14 = sshll.u32 %s270_s0, 4  ;;  %s234_s15 = smov [#allocation2]   ;;  %s25_s14 = int_to_ptr.hbm [resolvable:$true] %s24_s14 }
   0x4   :  { %s26_s16 = sshll.u32 %s234_s15, 4  ;;  %s41_s19 = sshll.u32 %s271_s1, 4  ;;  %s27_s16 = int_to_ptr.vmem [resolvable:$true] %s26_s16  ;;  %s42_s19 = int_to_ptr.hbm [resolvable:$true] %s41_s19 }
   0x5   :  { %29 = dma.hbm_to_vmem [thread:$0]  %s25_s14, 256, %s27_s16, [#allocation3]  }
   0x6   :  { %s235_s20 = smov [#allocation5]  }
   0x7   :  { %s43_s21 = sshll.u32 %s235_s20, 4  ;;  %s44_s21 = int_to_ptr.vmem [resolvable:$true] %s43_s21 }
   0x8   :  { %46 = dma.hbm_to_vmem [thread:$0]  %s42_s19, 256, %s44_s21, [#allocation6]  }
   0x9   :  { %226 = dma.done.wait [#allocation3], 256  }
   0xa   :  { %227 = vsyncadd [#allocation3], 4294967040 }
   0xb   :  { %228 = dma.done.wait [#allocation6], 256  }
   0xc   :  { %229 = vsyncadd [#allocation6], 4294967040  ;;  %v69_v0 = vld [vmem:[#allocation2] sm:$0xff]  ;;  %v70_v1 = vld [vmem:[#allocation5] sm:$0xff]  ;;  %s236_s0 = smov [#allocation7]   ;;  %s94_s24 = sshll.u32 %s272_s2, 4  ;;  %s95_s24 = int_to_ptr.hbm [resolvable:$true] %s94_s24 }
   0xd   :  { %v75_v2 = vld [vmem:[#allocation2 + $0x8] sm:$0xff]  ;;  %v71_v3 = vmul.f32 %v70_v1, %v69_v0  ;;  %v76_v4 = vld [vmem:[#allocation5 + $0x8] sm:$0xff]  ;;  %v73_v5 = vadd.f32 %v70_v1, %v69_v0  ;;  %s92_s1 = sshll.u32 %s236_s0, 4  ;;  %s237_s25 = smov [#allocation8]   ;;  %s93_s1 = int_to_ptr.vmem [resolvable:$true] %s92_s1 }
   0xe   :  { %v77_v6 = vmul.f32 %v76_v4, %v75_v2  ;;  %v79_v7 = vadd.f32 %v76_v4, %v75_v2  ;;  %s103_s26 = sshll.u32 %s237_s25, 4  ;;  %s105_s29 = sshll.u32 %s273_s3, 4  ;;  %s104_s26 = int_to_ptr.vmem [resolvable:$true] %s103_s26  ;;  %s106_s29 = int_to_ptr.hbm [resolvable:$true] %s105_s29 }
  0x10   :  { %v78_v8 = vadd.f32 %v77_v6, %v71_v3  ;;  %v80_v9 = vadd.f32 %v79_v7, %v73_v5 }
  0x12   :  { %83 = vst [vmem:[#allocation7] sm:$0xff] %v78_v8 }
  0x13   :  { %86 = vst [vmem:[#allocation8] sm:$0xff] %v80_v9  ;;  %97 = dma.vmem_to_hbm [thread:$0]  %s93_s1, 128, %s95_s24, [#allocation4]  }
  0x14   :  { %108 = dma.vmem_to_hbm [thread:$0]  %s104_s26, 128, %s106_s29, [#allocation9]  }
  0x15   :  { %230 = dma.done.wait [#allocation4], 128  }
  0x16   :  { %231 = vsyncadd [#allocation4], 4294967168 }
  0x17   :  { %232 = dma.done.wait [#allocation9], 128  }
  0x18   :  { %233 = vsyncadd [#allocation9], 4294967168 }
  0x19   :  { %117 = vsyncpa [#allocation3], 1 }
  0x1a   :  { %118 = vsyncpa [#allocation6], 1 }
  0x1b   :  { %119 = vsyncpa [#allocation4], 1 }
  0x1c   :  { %120 = vsyncpa [#allocation9], 1 }

</bundles_post_ra>
